<compile_context>
chip_gen: v6e
topology: v6e:2x2x1
jax: 0.10.0
libtpu: 0.0.40
codegen_flags: <defaults>
</compile_context>

<pallas_src>
import numpy as np

import jax
import jax.numpy as jnp
from jax.experimental import pallas as pl
from jax.experimental.pallas import tpu as pltpu

# ---------------- tiny model config (small-shape stand-in for flan-t5) -------
VOCAB = 64
HIDDEN = 32
N_HEADS = 4
HEAD_DIM = HIDDEN // N_HEADS
FFN = 64
N_LAYERS = 2
SEQ = 8          # max_length=32 in the torch module; small shape here
BATCH = 2
EPS = 1e-6
REL_BUCKETS = 8
REL_MAX_DIST = 16
NEG_INF = -1e9


# ----------------------------- fused Pallas kernel ---------------------------
def _rms(x, g):
    # T5 LayerNorm: no mean subtraction, no bias; stats kept in f32.
    var = jnp.mean(x * x, axis=-1, keepdims=True)
    return x * jax.lax.rsqrt(var + EPS) * g


def _tower_kernel(x0_ref, bias_ref, ln1_ref, wq_ref, wk_ref, wv_ref, wo_ref,
                  ln2_ref, wi_ref, wof_ref, lnf_ref, o_ref, x_acc):
    """One (batch b, layer l) grid step of the flan-T5-style encoder.

    x0_ref  : [S, H]      f32   embedded tokens for batch b (constant over l)
    bias_ref: [nH, S, S]  f32   rel-pos bias + key padding mask for batch b
    ln1_ref : [1, H]      f32   pre-attention RMSNorm weight, layer l
    wq/wk/wv: [nH, H, d]  bf16  per-head projection weights, layer l
    wo_ref  : [nH, d, H]  bf16  per-head output projection, layer l
    ln2_ref : [1, H]      f32   pre-FFN RMSNorm weight, layer l
    wi_ref  : [2, H, F]   bf16  gate / up FFN projections, layer l
    wof_ref : [F, H]      bf16  FFN down projection, layer l
    lnf_ref : [1, H]      f32   final RMSNorm weight
    o_ref   : [S, H]      f32   last_hidden_state for batch b (written at last l)
    x_acc   : [S, H]      f32   VMEM scratch: resident residual stream
    """
    bf16 = jnp.bfloat16
    l = pl.program_id(1)

    @pl.when(l == 0)
    def _():
        x_acc[...] = x0_ref[...]

    x = x_acc[...]                                            # [S, H] f32

    # ---- self-attention block (pre-norm residual), head-batched ----
    h = _rms(x, ln1_ref[...]).astype(bf16)                    # [S, H]
    hb = jnp.broadcast_to(h[None], (N_HEADS, SEQ, HIDDEN))    # [nH, S, H]
    q = jnp.einsum('nsh,nhd->nsd', hb, wq_ref[...],
                   preferred_element_type=jnp.float32)        # [nH, S, d]
    k = jnp.einsum('nsh,nhd->nsd', hb, wk_ref[...],
                   preferred_element_type=jnp.float32)
    v = jnp.einsum('nsh,nhd->nsd', hb, wv_ref[...],
                   preferred_element_type=jnp.float32)
    # T5 attention: no 1/sqrt(d) scaling; additive rel-pos bias + key mask.
    s = jnp.einsum('nqd,nkd->nqk', q.astype(bf16), k.astype(bf16),
                   preferred_element_type=jnp.float32)        # [nH, S, S]
    s = s + bias_ref[...]
    m = jnp.max(s, axis=-1, keepdims=True)
    p = jnp.exp(s - m)
    # EUP approximate reciprocal keeps the divide off the VPU (~1e-4 rel err
    # vs exact softmax; fine for inference with synthetic weights).
    p = p * pl.reciprocal(jnp.sum(p, axis=-1, keepdims=True), approx=True)
    ctx = jnp.einsum('nqk,nkd->nqd', p.astype(bf16), v.astype(bf16),
                     preferred_element_type=jnp.float32)      # [nH, S, d]
    # concat-over-heads @ Wo  ==  sum_n (ctx_n @ Wo_n); Wo pre-split per head,
    # so the head reduction is a cheap leading-axis VPU sum (no lane concat).
    oh = jnp.einsum('nqd,ndh->nqh', ctx.astype(bf16), wo_ref[...],
                    preferred_element_type=jnp.float32)       # [nH, S, H]
    x = x + jnp.sum(oh, axis=0)

    # ---- gated-GELU FFN block (pre-norm residual) ----
    h2 = _rms(x, ln2_ref[...]).astype(bf16)                   # [S, H]
    g = jax.nn.gelu(
        jnp.dot(h2, wi_ref[0], preferred_element_type=jnp.float32),
        approximate=True)                                     # gelu_new, [S, F]
    u = jnp.dot(h2, wi_ref[1], preferred_element_type=jnp.float32)
    x = x + jnp.dot((g * u).astype(bf16), wof_ref[...],
                    preferred_element_type=jnp.float32)

    x_acc[...] = x

    @pl.when(l == pl.num_programs(1) - 1)
    def _():
        o_ref[...] = _rms(x, lnf_ref[...])


def fused_tower(x0, bias, ln1, wq, wk, wv, wo, ln2, wi, wof, lnf):
    B, S, H = x0.shape
    L, nH, _, d = wq.shape
    F = wof.shape[1]

    # Advisory cost estimate so XLA schedules the call sensibly.
    flops = B * L * (
        3 * 2 * S * H * H          # q / k / v projections
        + 2 * 2 * S * S * H        # scores + context
        + 2 * S * H * H            # attention output projection
        + 2 * 2 * S * H * F        # gate + up
        + 2 * S * F * H)           # down projection
    transcendentals = B * L * (nH * S * S      # softmax exp
                               + S * F         # gelu tanh
                               + nH * S        # softmax reciprocal
                               + 2 * S) + B * S  # rsqrt in RMSNorms
    bytes_accessed = int(
        (x0.size + bias.size + x0.size) * 4
        + B * (ln1.size + ln2.size + lnf.size) * 4
        + B * (wq.size + wk.size + wv.size + wo.size + wi.size + wof.size) * 2)

    return pl.pallas_call(
        _tower_kernel,
        out_shape=jax.ShapeDtypeStruct((B, S, H), jnp.float32),
        grid=(B, L),
        in_specs=[
            pl.BlockSpec((None, S, H), lambda b, l: (b, 0, 0)),           # x0
            pl.BlockSpec((None, nH, S, S), lambda b, l: (b, 0, 0, 0)),    # bias
            pl.BlockSpec((None, 1, H), lambda b, l: (l, 0, 0)),           # ln1
            pl.BlockSpec((None, nH, H, d), lambda b, l: (l, 0, 0, 0)),    # wq
            pl.BlockSpec((None, nH, H, d), lambda b, l: (l, 0, 0, 0)),    # wk
            pl.BlockSpec((None, nH, H, d), lambda b, l: (l, 0, 0, 0)),    # wv
            pl.BlockSpec((None, nH, d, H), lambda b, l: (l, 0, 0, 0)),    # wo
            pl.BlockSpec((None, 1, H), lambda b, l: (l, 0, 0)),           # ln2
            pl.BlockSpec((None, 2, H, F), lambda b, l: (l, 0, 0, 0)),     # wi
            pl.BlockSpec((None, F, H), lambda b, l: (l, 0, 0)),           # wof
            pl.BlockSpec((1, H), lambda b, l: (0, 0)),                    # lnf
        ],
        out_specs=pl.BlockSpec((None, S, H), lambda b, l: (b, 0, 0)),
        scratch_shapes=[pltpu.VMEM((S, H), jnp.float32)],
        compiler_params=pltpu.CompilerParams(
            dimension_semantics=("parallel", "arbitrary"),
            vmem_limit_bytes=32 * 1024 * 1024),
        cost_estimate=pl.CostEstimate(flops=flops,
                                      transcendentals=transcendentals,
                                      bytes_accessed=bytes_accessed),
    )(x0, bias, ln1, wq, wk, wv, wo, ln2, wi, wof, lnf)


# ------------------------------ JAX glue --------------------------------
def _relative_position_bucket(rel_pos, num_buckets=REL_BUCKETS,
                              max_distance=REL_MAX_DIST):
    # T5 bidirectional relative-position bucketing.
    num_buckets //= 2
    ret = (rel_pos > 0).astype(jnp.int32) * num_buckets
    n = jnp.abs(rel_pos)
    max_exact = num_buckets // 2
    is_small = n < max_exact
    n_f = jnp.maximum(n.astype(jnp.float32), 1.0)   # keep log() finite; masked by where
    val_if_large = max_exact + (
        jnp.log(n_f / max_exact)
        / np.log(max_distance / max_exact)
        * (num_buckets - max_exact)
    ).astype(jnp.int32)
    val_if_large = jnp.minimum(val_if_large, num_buckets - 1)
    return ret + jnp.where(is_small, n, val_if_large)


def compute_position_bias(rel_bias_emb, seq_len):
    ctx = jnp.arange(seq_len)[:, None]
    mem = jnp.arange(seq_len)[None, :]
    bucket = _relative_position_bucket(mem - ctx)            # [S, S]
    bias = jnp.take(rel_bias_emb, bucket, axis=0)            # [S, S, nH]
    return jnp.transpose(bias, (2, 0, 1))                    # [nH, S, S]


def init_params(key):
    def nrm(k, shape, scale=0.02):
        return jax.random.normal(k, shape, dtype=jnp.float32) * scale

    keys = jax.random.split(key, 4 + N_LAYERS)
    params = {
        "embed": nrm(keys[0], (VOCAB, HIDDEN), 1.0),
        "rel_bias": nrm(keys[1], (REL_BUCKETS, N_HEADS), 1.0),
        "final_ln": jnp.ones((1, HIDDEN), jnp.float32),
        "layers": [],
    }
    for l in range(N_LAYERS):
        lk = jax.random.split(keys[4 + l], 8)
        params["layers"].append({
            "ln1": jnp.ones((1, HIDDEN), jnp.float32),
            "wq": nrm(lk[0], (HIDDEN, HIDDEN)),
            "wk": nrm(lk[1], (HIDDEN, HIDDEN)),
            "wv": nrm(lk[2], (HIDDEN, HIDDEN)),
            "wo": nrm(lk[3], (HIDDEN, HIDDEN)),
            "ln2": jnp.ones((1, HIDDEN), jnp.float32),
            "wi0": nrm(lk[4], (HIDDEN, FFN)),
            "wi1": nrm(lk[5], (HIDDEN, FFN)),
            "wo_ff": nrm(lk[6], (FFN, HIDDEN)),
        })
    return params


def blip2_text_tower_forward(params, token_ids, attn_mask):
    """token_ids:[B,S] int32, attn_mask:[B,S] float32 -> [B,S,HIDDEN] f32."""
    B, S = token_ids.shape
    H, nH, d = HIDDEN, N_HEADS, HEAD_DIM
    bf16 = jnp.bfloat16

    # Embedding gather (single XLA op); kept [B, S, H] so the kernel's batch
    # grid axis picks its own block.
    x0 = jnp.take(params["embed"], token_ids, axis=0)            # [B, S, H]

    # Position bias + key padding mask computed ONCE, reused by every layer.
    pos_bias = compute_position_bias(params["rel_bias"], S)      # [nH, S, S]
    mask_bias = (1.0 - attn_mask)[:, None, None, :] * NEG_INF    # [B, 1, 1, S]
    bias = pos_bias[None] + mask_bias                            # [B, nH, S, S]

    # Stack per-layer weights; matmul operands stored in bf16 (half VMEM),
    # per-head weights split along leading (non-lane) axes.
    layers = params["layers"]
    ln1 = jnp.stack([lay["ln1"] for lay in layers])                          # [L,1,H]
    ln2 = jnp.stack([lay["ln2"] for lay in layers])                          # [L,1,H]
    wq = jnp.stack([lay["wq"].reshape(H, nH, d).transpose(1, 0, 2)
                    for lay in layers]).astype(bf16)                         # [L,nH,H,d]
    wk = jnp.stack([lay["wk"].reshape(H, nH, d).transpose(1, 0, 2)
                    for lay in layers]).astype(bf16)
    wv = jnp.stack([lay["wv"].reshape(H, nH, d).transpose(1, 0, 2)
                    for lay in layers]).astype(bf16)
    wo = jnp.stack([lay["wo"].reshape(nH, d, H)
                    for lay in layers]).astype(bf16)                         # [L,nH,d,H]
    wi = jnp.stack([jnp.stack([lay["wi0"], lay["wi1"]])
                    for lay in layers]).astype(bf16)                         # [L,2,H,F]
    wof = jnp.stack([lay["wo_ff"] for lay in layers]).astype(bf16)           # [L,F,H]

    out = fused_tower(x0, bias, ln1, wq, wk, wv, wo, ln2, wi, wof,
                      params["final_ln"])
    return out   # last_hidden_state [B, S, HIDDEN]


if __name__ == "__main__":
    key = jax.random.PRNGKey(0)
    k_tok, k_param = jax.random.split(key)

    # Deterministic synthetic "tokenized" batch (stands in for the HF tokenizer).
    token_ids = jax.random.randint(k_tok, (BATCH, SEQ), 0, VOCAB, dtype=jnp.int32)
    # Padding mask: second sequence has 2 padded trailing positions.
    attn_mask = jnp.array(
        [[1.0] * SEQ,
         [1.0] * (SEQ - 2) + [0.0] * 2], dtype=jnp.float32)

    params = init_params(k_param)

    out = blip2_text_tower_forward(params, token_ids, attn_mask)
    out = jax.block_until_ready(out)

    assert out.shape == (BATCH, SEQ, HIDDEN), out.shape
    assert out.dtype == jnp.float32
    assert bool(jnp.all(jnp.isfinite(out)))
    print("KERNEL_OK")
</pallas_src>

<mosaic_0001>
module attributes {stable_mosaic.version = 11 : i64} {
  func.func @_tower_kernel(%arg0: i32, %arg1: i32, %arg2: memref<1x8x32xf32, #tpu.memory_space<vmem>>, %arg3: memref<1x4x8x8xf32, #tpu.memory_space<vmem>>, %arg4: memref<1x1x32xf32, #tpu.memory_space<vmem>>, %arg5: memref<1x4x32x8xbf16, #tpu.memory_space<vmem>>, %arg6: memref<1x4x32x8xbf16, #tpu.memory_space<vmem>>, %arg7: memref<1x4x32x8xbf16, #tpu.memory_space<vmem>>, %arg8: memref<1x4x8x32xbf16, #tpu.memory_space<vmem>>, %arg9: memref<1x1x32xf32, #tpu.memory_space<vmem>>, %arg10: memref<1x2x32x64xbf16, #tpu.memory_space<vmem>>, %arg11: memref<1x64x32xbf16, #tpu.memory_space<vmem>>, %arg12: memref<1x32xf32, #tpu.memory_space<vmem>>, %arg13: memref<1x8x32xf32, #tpu.memory_space<vmem>>, %arg14: memref<8x32xf32, #tpu.memory_space<vmem>>) attributes {dimension_semantics = [#tpu.dimension_semantics<parallel>, #tpu.dimension_semantics<arbitrary>], iteration_bounds = array<i64: 2, 2>, scalar_prefetch = 0 : i64, scratch_operands = 1 : i64, tpu.core_type = #tpu.core_type<tc>, window_params = [{transform_indices = @transform_0, window_bounds = array<i64: 1, 8, 32>}, {transform_indices = @transform_1, window_bounds = array<i64: 1, 4, 8, 8>}, {transform_indices = @transform_2, window_bounds = array<i64: 1, 1, 32>}, {transform_indices = @transform_3, window_bounds = array<i64: 1, 4, 32, 8>}, {transform_indices = @transform_4, window_bounds = array<i64: 1, 4, 32, 8>}, {transform_indices = @transform_5, window_bounds = array<i64: 1, 4, 32, 8>}, {transform_indices = @transform_6, window_bounds = array<i64: 1, 4, 8, 32>}, {transform_indices = @transform_7, window_bounds = array<i64: 1, 1, 32>}, {transform_indices = @transform_8, window_bounds = array<i64: 1, 2, 32, 64>}, {transform_indices = @transform_9, window_bounds = array<i64: 1, 64, 32>}, {pipeline_mode = #tpu.pipeline_mode<synchronous>, transform_indices = @transform_10, window_bounds = array<i64: 1, 32>}, {transform_indices = @transform_11, window_bounds = array<i64: 1, 8, 32>}]} {
    %c0_i32 = arith.constant 0 : i32
    %0 = arith.cmpi eq, %arg1, %c0_i32 : i32
    %1 = arith.extui %0 : i1 to i32
    %c0_i32_0 = arith.constant 0 : i32
    %2 = arith.cmpi ne, %1, %c0_i32_0 : i32
    scf.if %2 {
      %c0_62 = arith.constant 0 : index
      %c0_63 = arith.constant 0 : index
      %c0_64 = arith.constant 0 : index
      %100 = vector.load %arg2[%c0_62, %c0_63, %c0_64] : memref<1x8x32xf32, #tpu.memory_space<vmem>>, vector<1x8x32xf32>
      %101 = vector.shape_cast %100 : vector<1x8x32xf32> to vector<8x32xf32>
      %c0_65 = arith.constant 0 : index
      %c0_66 = arith.constant 0 : index
      %102 = vector.load %arg14[%c0_65, %c0_66] : memref<8x32xf32, #tpu.memory_space<vmem>>, vector<8x32xf32>
      tpu.vector_store %arg14[%c0_65, %c0_66], %101 {strides = array<i32>} : memref<8x32xf32, #tpu.memory_space<vmem>>, vector<8x32xf32>,
    } else {
    }
    %c0 = arith.constant 0 : index
    %c0_1 = arith.constant 0 : index
    %3 = vector.load %arg14[%c0, %c0_1] : memref<8x32xf32, #tpu.memory_space<vmem>>, vector<8x32xf32>
    %c0_2 = arith.constant 0 : index
    %c0_3 = arith.constant 0 : index
    %c0_4 = arith.constant 0 : index
    %4 = vector.load %arg4[%c0_2, %c0_3, %c0_4] : memref<1x1x32xf32, #tpu.memory_space<vmem>>, vector<1x1x32xf32>
    %5 = vector.shape_cast %4 : vector<1x1x32xf32> to vector<1x32xf32>
    %6 = arith.mulf %3, %3 : vector<8x32xf32>
    %cst = arith.constant dense<0.000000e+00> : vector<8xf32>
    %7 = vector.multi_reduction <add>, %6, %cst [1] : vector<8x32xf32> to vector<8xf32>
    %8 = vector.shape_cast %7 : vector<8xf32> to vector<8x1xf32>
    %cst_5 = arith.constant 3.200000e+01 : f32
    %9 = vector.broadcast %cst_5 : f32 to vector<8x1xf32>
    %10 = arith.divf %8, %9 : vector<8x1xf32>
    %cst_6 = arith.constant 9.99999997E-7 : f32
    %11 = vector.broadcast %cst_6 : f32 to vector<8x1xf32>
    %12 = arith.addf %10, %11 : vector<8x1xf32>
    %13 = math.rsqrt %12 : vector<8x1xf32>
    %14 = vector.broadcast %13 : vector<8x1xf32> to vector<8x32xf32>
    %15 = arith.mulf %3, %14 : vector<8x32xf32>
    %16 = vector.broadcast %5 : vector<1x32xf32> to vector<8x32xf32>
    %17 = arith.mulf %15, %16 : vector<8x32xf32>
    %18 = arith.truncf %17 : vector<8x32xf32> to vector<8x32xbf16>
    %19 = vector.shape_cast %18 : vector<8x32xbf16> to vector<1x8x32xbf16>
    %20 = vector.shape_cast %19 : vector<1x8x32xbf16> to vector<1x8x32xbf16>
    %21 = vector.broadcast %20 : vector<1x8x32xbf16> to vector<4x8x32xbf16>
    %c0_7 = arith.constant 0 : index
    %c0_8 = arith.constant 0 : index
    %c0_9 = arith.constant 0 : index
    %c0_10 = arith.constant 0 : index
    %22 = vector.load %arg5[%c0_7, %c0_8, %c0_9, %c0_10] : memref<1x4x32x8xbf16, #tpu.memory_space<vmem>>, vector<1x4x32x8xbf16>
    %23 = vector.shape_cast %22 : vector<1x4x32x8xbf16> to vector<4x32x8xbf16>
    "tpu.trace_start"() <{level = 10 : i32, message = "nsh,nhd->nsd"}> : () -> ()
    %cst_11 = arith.constant dense<0.000000e+00> : vector<4x8x8xf32>
    %24 = tpu.matmul %21, %23, %cst_11 {dimension_numbers = #tpu.dot_dimension_numbers<[2], [1], [1], [2], [0, 0, 0, 1, 1, 2], [0], [0]>} : vector<4x8x32xbf16>, vector<4x32x8xbf16>, vector<4x8x8xf32> -> vector<4x8x8xf32>
    "tpu.trace_stop"() : () -> ()
    %c0_12 = arith.constant 0 : index
    %c0_13 = arith.constant 0 : index
    %c0_14 = arith.constant 0 : index
    %c0_15 = arith.constant 0 : index
    %25 = vector.load %arg6[%c0_12, %c0_13, %c0_14, %c0_15] : memref<1x4x32x8xbf16, #tpu.memory_space<vmem>>, vector<1x4x32x8xbf16>
    %26 = vector.shape_cast %25 : vector<1x4x32x8xbf16> to vector<4x32x8xbf16>
    "tpu.trace_start"() <{level = 10 : i32, message = "nsh,nhd->nsd"}> : () -> ()
    %cst_16 = arith.constant dense<0.000000e+00> : vector<4x8x8xf32>
    %27 = tpu.matmul %21, %26, %cst_16 {dimension_numbers = #tpu.dot_dimension_numbers<[2], [1], [1], [2], [0, 0, 0, 1, 1, 2], [0], [0]>} : vector<4x8x32xbf16>, vector<4x32x8xbf16>, vector<4x8x8xf32> -> vector<4x8x8xf32>
    "tpu.trace_stop"() : () -> ()
    %c0_17 = arith.constant 0 : index
    %c0_18 = arith.constant 0 : index
    %c0_19 = arith.constant 0 : index
    %c0_20 = arith.constant 0 : index
    %28 = vector.load %arg7[%c0_17, %c0_18, %c0_19, %c0_20] : memref<1x4x32x8xbf16, #tpu.memory_space<vmem>>, vector<1x4x32x8xbf16>
    %29 = vector.shape_cast %28 : vector<1x4x32x8xbf16> to vector<4x32x8xbf16>
    "tpu.trace_start"() <{level = 10 : i32, message = "nsh,nhd->nsd"}> : () -> ()
    %cst_21 = arith.constant dense<0.000000e+00> : vector<4x8x8xf32>
    %30 = tpu.matmul %21, %29, %cst_21 {dimension_numbers = #tpu.dot_dimension_numbers<[2], [1], [1], [2], [0, 0, 0, 1, 1, 2], [0], [0]>} : vector<4x8x32xbf16>, vector<4x32x8xbf16>, vector<4x8x8xf32> -> vector<4x8x8xf32>
    "tpu.trace_stop"() : () -> ()
    %31 = arith.truncf %24 : vector<4x8x8xf32> to vector<4x8x8xbf16>
    %32 = arith.truncf %27 : vector<4x8x8xf32> to vector<4x8x8xbf16>
    "tpu.trace_start"() <{level = 10 : i32, message = "nqd,nkd->nqk"}> : () -> ()
    %cst_22 = arith.constant dense<0.000000e+00> : vector<4x8x8xf32>
    %33 = tpu.matmul %31, %32, %cst_22 {dimension_numbers = #tpu.dot_dimension_numbers<[2], [2], [1], [1], [0, 0, 0, 1, 1, 1], [0], [0]>} : vector<4x8x8xbf16>, vector<4x8x8xbf16>, vector<4x8x8xf32> -> vector<4x8x8xf32>
    "tpu.trace_stop"() : () -> ()
    %c0_23 = arith.constant 0 : index
    %c0_24 = arith.constant 0 : index
    %c0_25 = arith.constant 0 : index
    %c0_26 = arith.constant 0 : index
    %34 = vector.load %arg3[%c0_23, %c0_24, %c0_25, %c0_26] : memref<1x4x8x8xf32, #tpu.memory_space<vmem>>, vector<1x4x8x8xf32>
    %35 = vector.shape_cast %34 : vector<1x4x8x8xf32> to vector<4x8x8xf32>
    %36 = arith.addf %33, %35 : vector<4x8x8xf32>
    %cst_27 = arith.constant dense<0xFF800000> : vector<4x8xf32>
    %37 = vector.multi_reduction <maximumf>, %36, %cst_27 [2] : vector<4x8x8xf32> to vector<4x8xf32>
    %38 = vector.shape_cast %37 : vector<4x8xf32> to vector<4x8x1xf32>
    %39 = vector.broadcast %38 : vector<4x8x1xf32> to vector<4x8x8xf32>
    %40 = arith.subf %36, %39 : vector<4x8x8xf32>
    %41 = math.exp %40 : vector<4x8x8xf32>
    %cst_28 = arith.constant dense<0.000000e+00> : vector<4x8xf32>
    %42 = vector.multi_reduction <add>, %41, %cst_28 [2] : vector<4x8x8xf32> to vector<4x8xf32>
    %43 = vector.shape_cast %42 : vector<4x8xf32> to vector<4x8x1xf32>
    %44 = tpu.reciprocal %43 {approx = true} : vector<4x8x1xf32> -> vector<4x8x1xf32>
    %45 = vector.broadcast %44 : vector<4x8x1xf32> to vector<4x8x8xf32>
    %46 = arith.mulf %41, %45 : vector<4x8x8xf32>
    %47 = arith.truncf %46 : vector<4x8x8xf32> to vector<4x8x8xbf16>
    %48 = arith.truncf %30 : vector<4x8x8xf32> to vector<4x8x8xbf16>
    "tpu.trace_start"() <{level = 10 : i32, message = "nqk,nkd->nqd"}> : () -> ()
    %cst_29 = arith.constant dense<0.000000e+00> : vector<4x8x8xf32>
    %49 = tpu.matmul %47, %48, %cst_29 {dimension_numbers = #tpu.dot_dimension_numbers<[2], [1], [1], [2], [0, 0, 0, 1, 1, 2], [0], [0]>} : vector<4x8x8xbf16>, vector<4x8x8xbf16>, vector<4x8x8xf32> -> vector<4x8x8xf32>
    "tpu.trace_stop"() : () -> ()
    %50 = arith.truncf %49 : vector<4x8x8xf32> to vector<4x8x8xbf16>
    %c0_30 = arith.constant 0 : index
    %c0_31 = arith.constant 0 : index
    %c0_32 = arith.constant 0 : index
    %c0_33 = arith.constant 0 : index
    %51 = vector.load %arg8[%c0_30, %c0_31, %c0_32, %c0_33] : memref<1x4x8x32xbf16, #tpu.memory_space<vmem>>, vector<1x4x8x32xbf16>
    %52 = vector.shape_cast %51 : vector<1x4x8x32xbf16> to vector<4x8x32xbf16>
    "tpu.trace_start"() <{level = 10 : i32, message = "nqd,ndh->nqh"}> : () -> ()
    %cst_34 = arith.constant dense<0.000000e+00> : vector<4x8x32xf32>
    %53 = tpu.matmul %50, %52, %cst_34 {dimension_numbers = #tpu.dot_dimension_numbers<[2], [1], [1], [2], [0, 0, 0, 1, 1, 2], [0], [0]>} : vector<4x8x8xbf16>, vector<4x8x32xbf16>, vector<4x8x32xf32> -> vector<4x8x32xf32>
    "tpu.trace_stop"() : () -> ()
    %cst_35 = arith.constant dense<0.000000e+00> : vector<8x32xf32>
    %54 = vector.multi_reduction <add>, %53, %cst_35 [0] : vector<4x8x32xf32> to vector<8x32xf32>
    %55 = arith.addf %3, %54 : vector<8x32xf32>
    %c0_36 = arith.constant 0 : index
    %c0_37 = arith.constant 0 : index
    %c0_38 = arith.constant 0 : index
    %56 = vector.load %arg9[%c0_36, %c0_37, %c0_38] : memref<1x1x32xf32, #tpu.memory_space<vmem>>, vector<1x1x32xf32>
    %57 = vector.shape_cast %56 : vector<1x1x32xf32> to vector<1x32xf32>
    %58 = arith.mulf %55, %55 : vector<8x32xf32>
    %cst_39 = arith.constant dense<0.000000e+00> : vector<8xf32>
    %59 = vector.multi_reduction <add>, %58, %cst_39 [1] : vector<8x32xf32> to vector<8xf32>
    %60 = vector.shape_cast %59 : vector<8xf32> to vector<8x1xf32>
    %cst_40 = arith.constant 3.200000e+01 : f32
    %61 = vector.broadcast %cst_40 : f32 to vector<8x1xf32>
    %62 = arith.divf %60, %61 : vector<8x1xf32>
    %cst_41 = arith.constant 9.99999997E-7 : f32
    %63 = vector.broadcast %cst_41 : f32 to vector<8x1xf32>
    %64 = arith.addf %62, %63 : vector<8x1xf32>
    %65 = math.rsqrt %64 : vector<8x1xf32>
    %66 = vector.broadcast %65 : vector<8x1xf32> to vector<8x32xf32>
    %67 = arith.mulf %55, %66 : vector<8x32xf32>
    %68 = vector.broadcast %57 : vector<1x32xf32> to vector<8x32xf32>
    %69 = arith.mulf %67, %68 : vector<8x32xf32>
    %70 = arith.truncf %69 : vector<8x32xf32> to vector<8x32xbf16>
    %c0_42 = arith.constant 0 : index
    %c0_43 = arith.constant 0 : index
    %c0_44 = arith.constant 0 : index
    %c0_45 = arith.constant 0 : index
    %71 = vector.load %arg10[%c0_42, %c0_43, %c0_44, %c0_45] : memref<1x2x32x64xbf16, #tpu.memory_space<vmem>>, vector<1x1x32x64xbf16>
    %72 = vector.shape_cast %71 : vector<1x1x32x64xbf16> to vector<32x64xbf16>
    %cst_46 = arith.constant dense<0.000000e+00> : vector<8x64xf32>
    %73 = tpu.matmul %70, %72, %cst_46 {dimension_numbers = #tpu.dot_dimension_numbers<[1], [0], [0], [1], [0, 0, 1, 1], [], []>} : vector<8x32xbf16>, vector<32x64xbf16>, vector<8x64xf32> -> vector<8x64xf32>
    %74 = arith.mulf %73, %73 : vector<8x64xf32>
    %75 = arith.mulf %73, %74 : vector<8x64xf32>
    %cst_47 = arith.constant 4.471500e-02 : f32
    %76 = vector.broadcast %cst_47 : f32 to vector<8x64xf32>
    %77 = arith.mulf %76, %75 : vector<8x64xf32>
    %78 = arith.addf %73, %77 : vector<8x64xf32>
    %cst_48 = arith.constant 0.797884583 : f32
    %79 = vector.broadcast %cst_48 : f32 to vector<8x64xf32>
    %80 = arith.mulf %79, %78 : vector<8x64xf32>
    %81 = math.tanh %80 : vector<8x64xf32>
    %cst_49 = arith.constant 1.000000e+00 : f32
    %82 = vector.broadcast %cst_49 : f32 to vector<8x64xf32>
    %83 = arith.addf %82, %81 : vector<8x64xf32>
    %cst_50 = arith.constant 5.000000e-01 : f32
    %84 = vector.broadcast %cst_50 : f32 to vector<8x64xf32>
    %85 = arith.mulf %84, %83 : vector<8x64xf32>
    %86 = arith.mulf %73, %85 : vector<8x64xf32>
    %c0_51 = arith.constant 0 : index
    %c1 = arith.constant 1 : index
    %c0_52 = arith.constant 0 : index
    %c0_53 = arith.constant 0 : index
    %87 = vector.load %arg10[%c0_51, %c1, %c0_52, %c0_53] : memref<1x2x32x64xbf16, #tpu.memory_space<vmem>>, vector<1x1x32x64xbf16>
    %88 = vector.shape_cast %87 : vector<1x1x32x64xbf16> to vector<32x64xbf16>
    %cst_54 = arith.constant dense<0.000000e+00> : vector<8x64xf32>
    %89 = tpu.matmul %70, %88, %cst_54 {dimension_numbers = #tpu.dot_dimension_numbers<[1], [0], [0], [1], [0, 0, 1, 1], [], []>} : vector<8x32xbf16>, vector<32x64xbf16>, vector<8x64xf32> -> vector<8x64xf32>
    %90 = arith.mulf %86, %89 : vector<8x64xf32>
    %91 = arith.truncf %90 : vector<8x64xf32> to vector<8x64xbf16>
    %c0_55 = arith.constant 0 : index
    %c0_56 = arith.constant 0 : index
    %c0_57 = arith.constant 0 : index
    %92 = vector.load %arg11[%c0_55, %c0_56, %c0_57] : memref<1x64x32xbf16, #tpu.memory_space<vmem>>, vector<1x64x32xbf16>
    %93 = vector.shape_cast %92 : vector<1x64x32xbf16> to vector<64x32xbf16>
    %cst_58 = arith.constant dense<0.000000e+00> : vector<8x32xf32>
    %94 = tpu.matmul %91, %93, %cst_58 {dimension_numbers = #tpu.dot_dimension_numbers<[1], [0], [0], [1], [0, 0, 1, 1], [], []>} : vector<8x64xbf16>, vector<64x32xbf16>, vector<8x32xf32> -> vector<8x32xf32>
    %95 = arith.addf %55, %94 : vector<8x32xf32>
    %c0_59 = arith.constant 0 : index
    %c0_60 = arith.constant 0 : index
    %96 = vector.load %arg14[%c0_59, %c0_60] : memref<8x32xf32, #tpu.memory_space<vmem>>, vector<8x32xf32>
    tpu.vector_store %arg14[%c0_59, %c0_60], %95 {strides = array<i32>} : memref<8x32xf32, #tpu.memory_space<vmem>>, vector<8x32xf32>,
    %c1_i32 = arith.constant 1 : i32
    %97 = arith.cmpi eq, %arg1, %c1_i32 : i32
    %98 = arith.extui %97 : i1 to i32
    %c0_i32_61 = arith.constant 0 : i32
    %99 = arith.cmpi ne, %98, %c0_i32_61 : i32
    scf.if %99 {
      %c0_62 = arith.constant 0 : index
      %c0_63 = arith.constant 0 : index
      %100 = vector.load %arg12[%c0_62, %c0_63] : memref<1x32xf32, #tpu.memory_space<vmem>>, vector<1x32xf32>
      %101 = arith.mulf %95, %95 : vector<8x32xf32>
      %cst_64 = arith.constant dense<0.000000e+00> : vector<8xf32>
      %102 = vector.multi_reduction <add>, %101, %cst_64 [1] : vector<8x32xf32> to vector<8xf32>
      %103 = vector.shape_cast %102 : vector<8xf32> to vector<8x1xf32>
      %cst_65 = arith.constant 3.200000e+01 : f32
      %104 = vector.broadcast %cst_65 : f32 to vector<8x1xf32>
      %105 = arith.divf %103, %104 : vector<8x1xf32>
      %cst_66 = arith.constant 9.99999997E-7 : f32
      %106 = vector.broadcast %cst_66 : f32 to vector<8x1xf32>
      %107 = arith.addf %105, %106 : vector<8x1xf32>
      %108 = math.rsqrt %107 : vector<8x1xf32>
      %109 = vector.broadcast %108 : vector<8x1xf32> to vector<8x32xf32>
      %110 = arith.mulf %95, %109 : vector<8x32xf32>
      %111 = vector.broadcast %100 : vector<1x32xf32> to vector<8x32xf32>
      %112 = arith.mulf %110, %111 : vector<8x32xf32>
      %c0_67 = arith.constant 0 : index
      %c0_68 = arith.constant 0 : index
      %c0_69 = arith.constant 0 : index
      %113 = vector.load %arg13[%c0_67, %c0_68, %c0_69] : memref<1x8x32xf32, #tpu.memory_space<vmem>>, vector<1x8x32xf32>
      %114 = vector.shape_cast %113 : vector<1x8x32xf32> to vector<8x32xf32>
      %115 = vector.shape_cast %112 : vector<8x32xf32> to vector<1x8x32xf32>
      tpu.vector_store %arg13[%c0_67, %c0_68, %c0_69], %115 {strides = array<i32>} : memref<1x8x32xf32, #tpu.memory_space<vmem>>, vector<1x8x32xf32>,
    } else {
    }
    return
  }
  func.func @transform_0(%arg0: i32, %arg1: i32) -> (i32, i32, i32) {
    %c0_i32 = arith.constant 0 : i32
    %c0_i32_0 = arith.constant 0 : i32
    %c0_i32_1 = arith.constant 0 : i32
    return %arg0, %c0_i32, %c0_i32_0 : i32, i32, i32
  }
  func.func @transform_1(%arg0: i32, %arg1: i32) -> (i32, i32, i32, i32) {
    %c0_i32 = arith.constant 0 : i32
    %c0_i32_0 = arith.constant 0 : i32
    %c0_i32_1 = arith.constant 0 : i32
    %c0_i32_2 = arith.constant 0 : i32
    return %arg0, %c0_i32, %c0_i32_0, %c0_i32_1 : i32, i32, i32, i32
  }
  func.func @transform_2(%arg0: i32, %arg1: i32) -> (i32, i32, i32) {
    %c0_i32 = arith.constant 0 : i32
    %c0_i32_0 = arith.constant 0 : i32
    %c0_i32_1 = arith.constant 0 : i32
    return %arg1, %c0_i32, %c0_i32_0 : i32, i32, i32
  }
  func.func @transform_3(%arg0: i32, %arg1: i32) -> (i32, i32, i32, i32) {
    %c0_i32 = arith.constant 0 : i32
    %c0_i32_0 = arith.constant 0 : i32
    %c0_i32_1 = arith.constant 0 : i32
    %c0_i32_2 = arith.constant 0 : i32
    return %arg1, %c0_i32, %c0_i32_0, %c0_i32_1 : i32, i32, i32, i32
  }
  func.func @transform_4(%arg0: i32, %arg1: i32) -> (i32, i32, i32, i32) {
    %c0_i32 = arith.constant 0 : i32
    %c0_i32_0 = arith.constant 0 : i32
    %c0_i32_1 = arith.constant 0 : i32
    %c0_i32_2 = arith.constant 0 : i32
    return %arg1, %c0_i32, %c0_i32_0, %c0_i32_1 : i32, i32, i32, i32
  }
  func.func @transform_5(%arg0: i32, %arg1: i32) -> (i32, i32, i32, i32) {
    %c0_i32 = arith.constant 0 : i32
    %c0_i32_0 = arith.constant 0 : i32
    %c0_i32_1 = arith.constant 0 : i32
    %c0_i32_2 = arith.constant 0 : i32
    return %arg1, %c0_i32, %c0_i32_0, %c0_i32_1 : i32, i32, i32, i32
  }
  func.func @transform_6(%arg0: i32, %arg1: i32) -> (i32, i32, i32, i32) {
    %c0_i32 = arith.constant 0 : i32
    %c0_i32_0 = arith.constant 0 : i32
    %c0_i32_1 = arith.constant 0 : i32
    %c0_i32_2 = arith.constant 0 : i32
    return %arg1, %c0_i32, %c0_i32_0, %c0_i32_1 : i32, i32, i32, i32
  }
  func.func @transform_7(%arg0: i32, %arg1: i32) -> (i32, i32, i32) {
    %c0_i32 = arith.constant 0 : i32
    %c0_i32_0 = arith.constant 0 : i32
    %c0_i32_1 = arith.constant 0 : i32
    return %arg1, %c0_i32, %c0_i32_0 : i32, i32, i32
  }
  func.func @transform_8(%arg0: i32, %arg1: i32) -> (i32, i32, i32, i32) {
    %c0_i32 = arith.constant 0 : i32
    %c0_i32_0 = arith.constant 0 : i32
    %c0_i32_1 = arith.constant 0 : i32
    %c0_i32_2 = arith.constant 0 : i32
    return %arg1, %c0_i32, %c0_i32_0, %c0_i32_1 : i32, i32, i32, i32
  }
  func.func @transform_9(%arg0: i32, %arg1: i32) -> (i32, i32, i32) {
    %c0_i32 = arith.constant 0 : i32
    %c0_i32_0 = arith.constant 0 : i32
    %c0_i32_1 = arith.constant 0 : i32
    return %arg1, %c0_i32, %c0_i32_0 : i32, i32, i32
  }
  func.func @transform_10(%arg0: i32, %arg1: i32) -> (i32, i32) {
    %c0_i32 = arith.constant 0 : i32
    %c0_i32_0 = arith.constant 0 : i32
    %c0_i32_1 = arith.constant 0 : i32
    return %c0_i32, %c0_i32_0 : i32, i32
  }
  func.func @transform_11(%arg0: i32, %arg1: i32) -> (i32, i32, i32) {
    %c0_i32 = arith.constant 0 : i32
    %c0_i32_0 = arith.constant 0 : i32
    %c0_i32_1 = arith.constant 0 : i32
    return %arg0, %c0_i32, %c0_i32_0 : i32, i32, i32
  }
}

</mosaic_0001>

<bundles_post_ra>
// kernel: tpu_custom_call.1
= control target key start
LH: loop header
LB: loop body
LE: loop exit
PB: predicated region body
PF: predicated region fallthrough
CT: control target
= control target key end

     0   :  { %s3403_s0 = inlined_call_operand.vmem [shape: f32[2,8,32], index: 0, kind: input, shape index: {}]   ;;  %s3404_s1 = inlined_call_operand.vmem [shape: f32[2,4,8,8], index: 1, kind: input, shape index: {}]   ;;  %s3405_s2 = inlined_call_operand.vmem [shape: f32[2,1,32], index: 2, kind: input, shape index: {}]   ;;  %s3406_s3 = inlined_call_operand.vmem [shape: bf16[2,4,32,8], index: 3, kind: input, shape index: {}]   ;;  %s3407_s4 = inlined_call_operand.vmem [shape: bf16[2,4,32,8], index: 4, kind: input, shape index: {}]   ;;  %s3408_s5 = inlined_call_operand.vmem [shape: bf16[2,4,32,8], index: 5, kind: input, shape index: {}]   ;;  %s3409_s6 = inlined_call_operand.vmem [shape: bf16[2,4,8,32], index: 6, kind: input, shape index: {}]   ;;  %s3410_s7 = inlined_call_operand.vmem [shape: f32[2,1,32], index: 7, kind: input, shape index: {}]   ;;  %s3411_s8 = inlined_call_operand.vmem [shape: bf16[2,2,32,64], index: 8, kind: input, shape index: {}]   ;;  %s3412_s9 = inlined_call_operand.vmem [shape: bf16[2,64,32], index: 9, kind: input, shape index: {}]   ;;  %s3413_s10 = inlined_call_operand.vmem [shape: f32[1,32], index: 10, kind: input, shape index: {}]   ;;  %s3414_s11 = inlined_call_operand.hbm [shape: f32[2,8,32], index: 11, kind: output, shape index: {}]  }
   0x1   :  { %3429 = sst [smem:[#allocation18_spill]] %s3403_s0 }
   0x2   :  { %3430 = sst [smem:[#allocation19_spill]] %s3404_s1 }
   0x3   :  { %3431 = sst [smem:[#allocation20_spill]] %s3406_s3 }
   0x4   :  { %3432 = sst [smem:[#allocation21_spill]] %s3414_s11 }
   0x5   :  { %16 = vsyncpa [#allocation4], 0 }
   0x6   :  { %18 = vsyncpa [#allocation4 + $0x1], 0  ;;  %s2981_s17 = smov 0   ;;  %s2983_s18 = smov 0  }
   0x7   :  { %s2985_s19 = smov 0   ;;  %s2987_s20 = smov 0  }
   0x8   :  { %s2989_s21 = smov 0   ;;  %s2991_s22 = smov 0  }
   0x9   :  { %s2993_s23 = smov 0   ;;  %s2995_s24 = smov 0  }
   0xa LB: > { %3433 = sst [smem:[#allocation6_spill]] %s2888_s17  ;;  %s2328_s25 = sadd.s32 4294967295, %s2916_s24   ;;  %s2916_s24 = sphi %s2995_s24, %s24_s24   ;;  %s2912_s23 = sphi %s2993_s23, %s3466_s23   ;;  %s2908_s22 = sphi %s2991_s22, %s3465_s22   ;;  %s2904_s21 = sphi %s2989_s21, %s3464_s21   ;;  %s2900_s20 = sphi %s2987_s20, %s3463_s20   ;;  %s2896_s19 = sphi %s2985_s19, %s3462_s19   ;;  %s2892_s18 = sphi %s2983_s18, %s3461_s18   ;;  %s2888_s17 = sphi %s2981_s17, %s3460_s17  }
   0xb   : > { %3434 = sst [smem:[#allocation7_spill]] %s2892_s18  ;;  %s2329_s26 = sadd.s32 4294967294, %s2916_s24  }
   0xc   : > { %3435 = sst [smem:[#allocation8_spill]] %s2896_s19  ;;  %s33_s27 = sadd.s32 1, %s2908_s22 }
   0xd   : > { %3436 = sst [smem:[#allocation9_spill]] %s2904_s21  ;;  %p34_p0 = scmp.ge.s32.totalorder %s33_s27, 2 }
   0xe   : > { %3437 = sst [smem:[#allocation10_spill]] %s2908_s22  ;;  %s36_s28 = sadd.s32 1, %s2912_s23 }
   0xf   : > { %3438 = sst [smem:[#allocation11_spill]] %s2912_s23  ;;  %p334_p1 = scmp.ne.s32.totalorder %s2896_s19, %s2892_s18 }
  0x10   : > { %3439 = sst [smem:[#allocation12_spill]] %s2916_s24  ;;  %p335_p2 = scmp.eq.s32.totalorder %s2328_s25, 3 }
  0x11   : > { %s3468_s27 = smov (%p34_p0, %s33_s27), 0  ;;  %s3470_s28 = smov (!%p34_p0, %s36_s28), %s2912_s23 }
  0x12   : > { %3440 = sst [smem:[#allocation13_spill]] %s3468_s27  ;;  %p3030_p3 = por %p335_p2, %p334_p1 }
  0x13   : > { %p340_p4 = scmp.ne.s32.totalorder %s2892_s18, %s2888_s17  ;;  %p38_p5 = scmp.ge.s32.totalorder %s3470_s28, 2 }
  0x14   : > { %s3441_s29 = scalar_select %p3030_p3, 1, 0 }
  0x15   : > { %p341_p6 = scmp.eq.s32.totalorder %s2329_s26, 3  ;;  %p2332_p7 = scmp.ge.s32.totalorder %s2916_s24, 1 }
  0x16   : > { %3442 = sst [smem:[#allocation14_spill]] %s3441_s29  ;;  %p437_p8 = scmp.lt.s32.totalorder %s2916_s24, 5 }
  0x17   : > { %s3472_s28 = smov (%p38_p5, %s3470_s28), 0  ;;  %p3040_p9 = por %p341_p6, %p340_p4 }
  0x18   : > { %3443 = sst [smem:[#allocation15_spill]] %s3472_s28  ;;  %p438_p10 = pnand %p2332_p7, %p437_p8 }
  0x19   : > { %s3444_s30 = scalar_select %p3040_p9, 1, 0 }
  0x1a   : > { %s321_s12 = ssub.s32 %s2912_s23, %s3472_s28  ;;  %s324_s13 = sadd.s32 1, %s2896_s19 }
  0x1b   : > { %3445 = sst [smem:[#allocation16_spill]] %s3444_s30  ;;  %p322_p11 = scmp.eq.s32.totalorder %s321_s12, 0 }
  0x1c   : > { %441 = sbr.rel (%p438_p10) target bundleno = 2138 (0x85a), region = 64  ;;  %s3418_s15 = sand.u32 (!%p438_p10), 1, %s2892_s18  }
  0x1d   : > { %s3048_s14 = scalar_select %p322_p11, %s2896_s19, %s324_s13  }
  0x1e   : > { %p517_p12 = scmp.lt.s32.totalorder (!%p438_p10), %s2904_s21, 1  ;;  %s3054_s16 = sshll.u32 (!%p438_p10), %s3418_s15, 3 }
  0x1f   : > { %3446 = sst [smem:[#allocation17_spill]] %s3048_s14  ;;  %p526_p13 = scmp.lt.s32.totalorder (!%p438_p10), %s2900_s20, 1 }
  0x20   : > { %s3447_s0 = sld [smem:[#allocation18_spill]] (!%p438_p10)  ;;  %p2349_p0 = scmp.ne.s32.totalorder (!%p438_p10), %s2900_s20, 0 }
  0x21   : > { %s518_s25 = scalar_select %p517_p12, %s2904_s21, 1 }
  0x22   : > { %s3059_s26 = scalar_select %p526_p13, %s2900_s20, 1 }
  0x23   : > { %s2334_s12 = sshll.u32 %s518_s25, 3  ;;  %s2421_s13 = sshll.u32 %s518_s25, 5 }
  0x24   : > { %s3448_s1 = sld [smem:[#allocation19_spill]]  ;;  %s2422_s24 = sshll.u32 %s3059_s26, 6 }
  0x25   : > { %s3449_s3 = sld [smem:[#allocation20_spill]]  ;;  %s3082_s27 = scalar_lea.vmem %s3407_s4, %s2422_s24 }
  0x26   : > { %s520_s23 = scalar_lea.vmem %s3447_s0, %s2334_s12  ;;  %s3087_s22 = scalar_lea.vmem %s3408_s5, %s2422_s24 }
  0x27   : > { %s2425_s14 = sshll.u32 %s3059_s26, 4  ;;  %s551_s29 = scalar_lea.vmem %s3410_s7, %s3059_s26 }
  0x28   : > { %s3093_s30 = scalar_lea.vmem %s3409_s6, %s2425_s14  ;;  %s2426_s0 = sshll.u32 %s3059_s26, 5 }
  0x29   : > { %s3103_s25 = scalar_lea.vmem %s3411_s8, %s2426_s0  ;;  %s516_s12 = scalar_lea.vmem [#allocation3], %s3054_s16 }
  0x2a   : > { %s3067_s15 = scalar_lea.vmem %s3448_s1, %s2421_s13  ;;  %566 = sbr.rel (%p2349_p0) target bundleno = 49 (0x31), region = 68 }
  0x2b   : > { %s3077_s18 = scalar_lea.vmem %s3449_s3, %s2422_s24  ;;  %s3108_s24 = scalar_lea.vmem %s3412_s9, %s2426_s0 }
  0x2f   : > { %v567_v0 = vld [vmem:[%s520_s23] sm:$0xff]  ;;  %vm568_vm0 = vcmask 261120  }
  0x30   : > { %569 = vst.msk [vmem:[#allocation2] sm:$0xff] %vm568_vm0, %v567_v0 }
  0x31 PF: > { %vm573_vm1 = vcmask 261120   ;;  %v2768_v4 = vld [vmem:[%s3077_s18 + $0x8] sm:$0xff]   ;;  %v2918_v6 = vmov 0.0   ;;  %v2770_v7 = vld [vmem:[%s3077_s18] sm:$0xff]   ;;  %vm2919_vm2 = vmmov 0   ;;  %s3450_s3 = scalar_lea.vmem %s3405_s2, %s3059_s26  ;;  %v2772_v16 = vld [vmem:[%s3077_s18 + $0x18] sm:$0xff]  }
  0x32   : > { %v2769_v5 = vld [vmem:[%s3077_s18 + $0x28] sm:$0xff]   ;;  %2499 = vmatprep.subr.bf16.mxu1 %v2918_v6  ;;  %2515 = vmatprep.subr.bf16.mxu0 %v2918_v6  ;;  %v2771_v8 = vld [vmem:[%s3077_s18 + $0x20] sm:$0xff]   ;;  %v2774_v19 = vld [vmem:[%s3077_s18 + $0x10] sm:$0xff]   ;;  %vm1277_vm3 = vcmask 64512   ;;  %vm1517_vm4 = vcmask 1043456   ;;  %vm2075_vm5 = vcmask 523264  }
  0x33   : > { %2500 = vmatpush3.bf16.msra.mxu1 %v2768_v4  ;;  %2516 = vmatpush3.bf16.msra.mxu0 %v2769_v5  ;;  %v2350_v13 = vld [vmem:[%s3450_s3] ss:$0 sm:$0xff]  ;;  %v2773_v17 = vld [vmem:[%s3082_s27 + $0x8] sm:$0xff]   ;;  %v2776_v21 = vld [vmem:[%s3077_s18 + $0x38] sm:$0xff]   ;;  %p2415_p1 = scmp.ne.s32.totalorder %s2900_s20, 1 }
  0x34   : > { %2501 = vmatprep.subr.bf16.mxu1 %v2918_v6  ;;  %2517 = vmatprep.subr.bf16.mxu0 %v2918_v6  ;;  %v2775_v20 = vld [vmem:[%s3082_s27] sm:$0xff]   ;;  %v2777_v22 = vld [vmem:[%s3082_s27 + $0x28] sm:$0xff]   ;;  %v2778_v23 = vld [vmem:[%s3077_s18 + $0x30] sm:$0xff]  }
  0x35   : > { %2503 = vmatprep.mubr.msk.bf16.mxu1 %vm2919_vm2, %v2918_v6  ;;  %2519 = vmatprep.mubr.msk.bf16.mxu0 %vm2919_vm2, %v2918_v6  ;;  %v2779_v24 = vld [vmem:[%s3082_s27 + $0x20] sm:$0xff]   ;;  %v2780_v25 = vld [vmem:[%s3082_s27 + $0x18] sm:$0xff]   ;;  %v2781_v26 = vld [vmem:[%s3087_s22 + $0x8] sm:$0xff]  }
  0x36   : > { %v2782_v27 = vld [vmem:[%s3082_s27 + $0x10] sm:$0xff]   ;;  %v2783_v28 = vld [vmem:[%s3087_s22] sm:$0xff]   ;;  %v2784_v29 = vld [vmem:[%s3082_s27 + $0x38] sm:$0xff]  }
  0x37   : > { %v3112_v1 = vld [vmem:[#allocation2] sm:$0xff]  ;;  %2502 = vmatpush3.bf16.msra.mxu1 %v2770_v7  ;;  %2518 = vmatpush3.bf16.msra.mxu0 %v2771_v8  ;;  %v2785_v30 = vld [vmem:[%s3087_s22 + $0x28] sm:$0xff]   ;;  %v2786_v31 = vld [vmem:[%s3082_s27 + $0x30] sm:$0xff]  }
  0x38   : > { %v572_v2 = vmul.f32 %v3112_v1, %v3112_v1  ;;  %2507 = vmatprep.subr.bf16.mxu1 %v2918_v6  ;;  %2531 = vmatprep.subr.bf16.mxu0 %v2918_v6  ;;  %v2787_v32 = vld [vmem:[%s3087_s22 + $0x20] sm:$0xff]   ;;  %v2788_v33 = vld [vmem:[%s3087_s22 + $0x18] sm:$0xff]   ;;  %v2789_v34 = vld [vmem:[%s3087_s22 + $0x10] sm:$0xff]  }
  0x39   : > { %v2790_v35 = vld [vmem:[%s3087_s22 + $0x38] sm:$0xff]   ;;  %v2791_v36 = vld [vmem:[%s3087_s22 + $0x30] sm:$0xff]  }
  0x3a   : > { %v574_v3 = vsel %vm573_vm1, %v572_v2, 0.0 }
  0x3b   : > { %575 = vadd.xlane.f32.xlu0 %v574_v3 }
  0xc4   : > { %v576_v9 = vpop.xlane.xlu0 %575 }
  0xc5   : > { %v578_v10 = vmul.f32 0.03125, %v576_v9 }
  0xc7   : > { %v579_v11 = vadd.f32 1e-06, %v578_v10 }
  0xc9   : > { %2800 = vrsqrt.f32 %v579_v11 }
  0xd6   : > { %v2801_v12 = vpop.eup %2800 }
  0xd7   : > { %v581_v14 = vmul.f32 %v2801_v12, %v3112_v1 }
  0xd9   : > { %v588_v15 = vmul.f32 %v2350_v13, %v581_v14 }
  0xdb   : > { %v3139_v18 = vpack.c.bf16 %v588_v15, %v588_v15 }
  0xdd   : > { %2504 = vmatmul.mubr.msk.bf16.vlgmr.msra.gmra.mxu1 %vm573_vm1, %v3139_v18  ;;  %2520 = vmatmul.mubr.msk.bf16.vlgmr.msra.gmra.mxu0 %vm573_vm1, %v3139_v18 }
  0xde   : > { %2508 = vmatpush3.bf16.msra.mxu1 %v2772_v16  ;;  %2532 = vmatpush3.bf16.msra.mxu0 %v2773_v17 }
  0xdf   : > { %2509 = vmatprep.subr.bf16.mxu1 %v2918_v6  ;;  %2533 = vmatprep.subr.bf16.mxu0 %v2918_v6 }
  0xe0   : > { %2511 = vmatprep.mubr.msk.bf16.mxu1 %vm2919_vm2, %v2918_v6  ;;  %2535 = vmatprep.mubr.msk.bf16.mxu0 %vm2919_vm2, %v2918_v6 }
  0xe2   : > { %2510 = vmatpush3.bf16.msra.mxu1 %v2774_v19  ;;  %2534 = vmatpush3.bf16.msra.mxu0 %v2775_v20 }
  0xe3   : > { %2523 = vmatprep.subr.bf16.mxu1 %v2918_v6  ;;  %2547 = vmatprep.subr.bf16.mxu0 %v2918_v6 }
  0xe5   : > { %2512 = vmatmul.mubr.msk.bf16.vlgmr.msra.gmra.mxu1 %vm573_vm1, %v3139_v18  ;;  %2536 = vmatmul.mubr.msk.bf16.vlgmr.msra.gmra.mxu0 %vm573_vm1, %v3139_v18 }
  0xe6   : > { %2524 = vmatpush3.bf16.msra.mxu1 %v2776_v21  ;;  %2548 = vmatpush3.bf16.msra.mxu0 %v2777_v22 }
  0xe7   : > { %2525 = vmatprep.subr.bf16.mxu1 %v2918_v6  ;;  %2549 = vmatprep.subr.bf16.mxu0 %v2918_v6 }
  0xe8   : > { %2527 = vmatprep.mubr.msk.bf16.mxu1 %vm2919_vm2, %v2918_v6  ;;  %2551 = vmatprep.mubr.msk.bf16.mxu0 %vm2919_vm2, %v2918_v6 }
  0xea   : > { %2526 = vmatpush3.bf16.msra.mxu1 %v2778_v23  ;;  %2550 = vmatpush3.bf16.msra.mxu0 %v2779_v24 }
  0xeb   : > { %2539 = vmatprep.subr.bf16.mxu1 %v2918_v6  ;;  %2563 = vmatprep.subr.bf16.mxu0 %v2918_v6 }
  0xed   : > { %2528 = vmatmul.mubr.msk.bf16.vlgmr.msra.gmra.mxu1 %vm573_vm1, %v3139_v18  ;;  %2552 = vmatmul.mubr.msk.bf16.vlgmr.msra.gmra.mxu0 %vm573_vm1, %v3139_v18 }
  0xee   : > { %2540 = vmatpush3.bf16.msra.mxu1 %v2780_v25  ;;  %2564 = vmatpush3.bf16.msra.mxu0 %v2781_v26 }
  0xef   : > { %2541 = vmatprep.subr.bf16.mxu1 %v2918_v6  ;;  %2565 = vmatprep.subr.bf16.mxu0 %v2918_v6 }
  0xf0   : > { %2543 = vmatprep.mubr.msk.bf16.mxu1 %vm2919_vm2, %v2918_v6  ;;  %2567 = vmatprep.mubr.msk.bf16.mxu0 %vm2919_vm2, %v2918_v6 }
  0xf2   : > { %2542 = vmatpush3.bf16.msra.mxu1 %v2782_v27  ;;  %2566 = vmatpush3.bf16.msra.mxu0 %v2783_v28 }
  0xf3   : > { %2555 = vmatprep.subr.bf16.mxu1 %v2918_v6  ;;  %2579 = vmatprep.subr.bf16.mxu0 %v2918_v6 }
  0xf5   : > { %2544 = vmatmul.mubr.msk.bf16.vlgmr.msra.gmra.mxu1 %vm573_vm1, %v3139_v18  ;;  %2568 = vmatmul.mubr.msk.bf16.vlgmr.msra.gmra.mxu0 %vm573_vm1, %v3139_v18 }
  0xf6   : > { %2556 = vmatpush3.bf16.msra.mxu1 %v2784_v29  ;;  %2580 = vmatpush3.bf16.msra.mxu0 %v2785_v30 }
  0xf7   : > { %2557 = vmatprep.subr.bf16.mxu1 %v2918_v6  ;;  %2581 = vmatprep.subr.bf16.mxu0 %v2918_v6 }
  0xf8   : > { %2559 = vmatprep.mubr.msk.bf16.mxu1 %vm2919_vm2, %v2918_v6  ;;  %2583 = vmatprep.mubr.msk.bf16.mxu0 %vm2919_vm2, %v2918_v6 }
  0xfa   : > { %2558 = vmatpush3.bf16.msra.mxu1 %v2786_v31  ;;  %2582 = vmatpush3.bf16.msra.mxu0 %v2787_v32 }
  0xfb   : > { %2571 = vmatprep.subr.bf16.mxu1 %v2918_v6  ;;  %2595 = vmatprep.subr.bf16.mxu0 %v2918_v6 }
  0xfd   : > { %2560 = vmatmul.mubr.msk.bf16.vlgmr.msra.gmra.mxu1 %vm573_vm1, %v3139_v18  ;;  %2584 = vmatmul.mubr.msk.bf16.vlgmr.msra.gmra.mxu0 %vm573_vm1, %v3139_v18 }
  0xfe   : > { %2572 = vmatpush3.bf16.msra.mxu1 %v2788_v33  ;;  %2575 = vmatprep.mubr.msk.bf16.mxu1 %vm2919_vm2, %v2918_v6 }
  0xff   : > { %2573 = vmatprep.subr.bf16.mxu1 %v2918_v6  ;;  %2597 = vmatprep.mubr.msk.bf16.mxu0 %vm2919_vm2, %v2918_v6 }
 0x102   : > { %2574 = vmatpush3.bf16.msra.mxu1 %v2789_v34 }
 0x103   : > { %2587 = vmatprep.subr.bf16.mxu1 %v2918_v6 }
 0x105   : > { %2576 = vmatmul.mubr.msk.bf16.vlgmr.msra.gmra.mxu1 %vm573_vm1, %v3139_v18 }
 0x106   : > { %2588 = vmatpush3.bf16.msra.mxu1 %v2790_v35  ;;  %2591 = vmatprep.mubr.msk.bf16.mxu1 %vm2919_vm2, %v2918_v6 }
 0x107   : > { %2589 = vmatprep.subr.bf16.mxu1 %v2918_v6 }
 0x10a   : > { %2590 = vmatpush3.bf16.msra.mxu1 %v2791_v36 }
 0x10b   : > { %2601 = vmatprep.subr.bf16.mxu1 %v2918_v6 }
 0x10d   : > { %2592 = vmatmul.mubr.msk.bf16.vlgmr.msra.gmra.mxu1 %vm573_vm1, %v3139_v18 }
 0x10e   : > { %2603 = vmatprep.mubr.msk.bf16.mxu1 %vm2919_vm2, %v2918_v6 }
 0x19d   : > { %v655_v37 = vpop.f32.mrf.mxu1  ;;  %v759_v38 = vpop.f32.mrf.mxu0 }
 0x19e   : > { %v1265_v57 = vpack.c.bf16 %v655_v37, %v655_v37  ;;  %v1267_v5 = vpack.c.bf16 %v759_v38, %v759_v38 }
 0x19f   : > { %v2505_v39 = vpop.f32.mrf.mxu1  ;;  %v2521_v40 = vpop.f32.mrf.mxu0 }
 0x1a0   : > { %v1273_v39 = vld [vmem:[%s3067_s15] sm:$0xff] }
 0x1a1   : > { %v658_v41 = vpop.f32.mrf.mxu1  ;;  %v762_v42 = vpop.f32.mrf.mxu0 }
 0x1a3   : > { %v2506_v43 = vpop.f32.mrf.mxu1  ;;  %v2522_v44 = vpop.f32.mrf.mxu0 }
 0x1a5   : > { %v707_v45 = vpop.f32.mrf.mxu1  ;;  %v879_v46 = vpop.f32.mrf.mxu0 }
 0x1a6   : > { %v1269_v47 = vpack.c.bf16 %v879_v46, %v879_v46  ;;  %v1266_v19 = vpack.c.bf16 %v707_v45, %v707_v45 }
 0x1a7   : > { %v2513_v48 = vpop.f32.mrf.mxu1  ;;  %v2537_v49 = vpop.f32.mrf.mxu0 }
 0x1a8   : > { %v1282_v50 = vsel %vm1277_vm3, %v1269_v47, 0 }
 0x1a9   : > { %v710_v51 = vpop.f32.mrf.mxu1  ;;  %v882_v52 = vpop.f32.mrf.mxu0  ;;  %2596 = vmatpush3.bf16.xpose.msra.mxu0 %v1282_v50  ;;  %v1274_v50 = vld [vmem:[%s3067_s15 + $0x8] sm:$0xff] }
 0x1aa   : > { %2607 = vmatprep.subr.bf16.mxu0 %v2918_v6  ;;  %v1275_v51 = vld [vmem:[%s3067_s15 + $0x10] sm:$0xff] }
 0x1ab   : > { %v2514_v53 = vpop.f32.mrf.mxu1  ;;  %v2538_v54 = vpop.f32.mrf.mxu0 }
 0x1ad   : > { %v811_v55 = vpop.f32.mrf.mxu1  ;;  %v983_v56 = vpop.f32.mrf.mxu0 }
 0x1ae   : > { %v1271_v58 = vpack.c.bf16 %v983_v56, %v983_v56  ;;  %v1268_v29 = vpack.c.bf16 %v811_v55, %v811_v55 }
 0x1af   : > { %v2529_v59 = vpop.f32.mrf.mxu1  ;;  %v2553_v60 = vpop.f32.mrf.mxu0 }
 0x1b0   : > { %v1374_v61 = vsel %vm1277_vm3, %v1271_v58, 0  ;;  %2598 = vmatmul.mubr.msk.bf16.vlgmr.msra.gmra.mxu0 %vm1277_vm3, %v1265_v57  ;;  %v1276_v59 = vld [vmem:[%s3067_s15 + $0x18] sm:$0xff] }
 0x1b1   : > { %v814_v62 = vpop.f32.mrf.mxu1  ;;  %v986_v63 = vpop.f32.mrf.mxu0  ;;  %2608 = vmatpush3.bf16.xpose.msra.mxu0 %v1374_v61  ;;  %2609 = vmatprep.mubr.msk.bf16.mxu0 %vm2919_vm2, %v2918_v6 }
 0x1b2   : > { %2619 = vmatprep.subr.bf16.mxu0 %v2918_v6 }
 0x1b3   : > { %v2530_v0 = vpop.f32.mrf.mxu1  ;;  %v2554_v2 = vpop.f32.mrf.mxu0 }
 0x1b5   : > { %v931_v3 = vpop.f32.mrf.mxu1  ;;  %v1103_v4 = vpop.f32.mrf.mxu0 }
 0x1b6   : > { %v1270_v7 = vpack.c.bf16 %v931_v3, %v931_v3  ;;  %v1510_v8 = vpack.c.bf16 %v1103_v4, %v1103_v4 }
 0x1b7   : > { %v2545_v9 = vpop.f32.mrf.mxu1  ;;  %v2569_v10 = vpop.f32.mrf.mxu0 }
 0x1b8   : > { %v1328_v11 = vsel %vm1277_vm3, %v1270_v7, 0  ;;  %v1519_v12 = vsel %vm1517_vm4, %v1510_v8, 0  ;;  %2610 = vmatmul.mubr.msk.bf16.vlgmr.msra.gmra.mxu0 %vm1277_vm3, %v1267_v5 }
 0x1b9   : > { %v934_v13 = vpop.f32.mrf.mxu1  ;;  %v1106_v14 = vpop.f32.mrf.mxu0  ;;  %2602 = vmatpush3.bf16.xpose.msra.mxu1 %v1328_v11  ;;  %2620 = vmatpush3.bf16.msra.mxu0 %v1519_v12 }
 0x1ba   : > { %2613 = vmatprep.subr.bf16.mxu1 %v2918_v6  ;;  %2621 = vmatprep.mubr.msk.bf16.mxu0 %vm2919_vm2, %v2918_v6 }
 0x1bb   : > { %v2546_v15 = vpop.f32.mrf.mxu1  ;;  %v2570_v16 = vpop.f32.mrf.mxu0  ;;  %2631 = vmatprep.subr.bf16.mxu0 %v2918_v6 }
 0x1bd   : > { %v1035_v17 = vpop.f32.mrf.mxu1  ;;  %v3241_v18 = vpop.f32.mrf.mxu0 }
 0x1be   : > { %v1272_v20 = vpack.c.bf16 %v1035_v17, %v1035_v17 }
 0x1bf   : > { %v2561_v21 = vpop.f32.mrf.mxu1  ;;  %v2585_v22 = vpop.f32.mrf.mxu0 }
 0x1c0   : > { %v1420_v23 = vsel %vm1277_vm3, %v1272_v20, 0  ;;  %2604 = vmatmul.mubr.msk.bf16.vlgmr.msra.gmra.mxu1 %vm1277_vm3, %v1266_v19 }
 0x1c1   : > { %v1038_v24 = vpop.f32.mrf.mxu1  ;;  %v1210_v25 = vpop.f32.mrf.mxu0  ;;  %2614 = vmatpush3.bf16.xpose.msra.mxu1 %v1420_v23  ;;  %2615 = vmatprep.mubr.msk.bf16.mxu1 %vm2919_vm2, %v2918_v6 }
 0x1c2   : > { %2625 = vmatprep.subr.bf16.mxu1 %v2918_v6 }
 0x1c3   : > { %v2562_v26 = vpop.f32.mrf.mxu1  ;;  %v2586_v27 = vpop.f32.mrf.mxu0 }
 0x1c5   : > { %v1155_v28 = vpop.f32.mrf.mxu1 }
 0x1c6   : > { %v1511_v30 = vpack.c.bf16 %v1155_v28, %v1155_v28  ;;  %v1512_v28 = vpack.c.bf16 %v3241_v18, %v3241_v18 }
 0x1c7   : > { %v2577_v31 = vpop.f32.mrf.mxu1 }
 0x1c8   : > { %v1565_v32 = vsel %vm1517_vm4, %v1511_v30, 0  ;;  %2616 = vmatmul.mubr.msk.bf16.vlgmr.msra.gmra.mxu1 %vm1277_vm3, %v1268_v29 }
 0x1c9   : > { %v1158_v33 = vpop.f32.mrf.mxu1  ;;  %2626 = vmatpush3.bf16.msra.mxu1 %v1565_v32  ;;  %2627 = vmatprep.mubr.msk.bf16.mxu1 %vm2919_vm2, %v2918_v6  ;;  %v1611_v32 = vsel %vm1517_vm4, %v1512_v28, 0 }
 0x1ca   : > { %2637 = vmatprep.subr.bf16.mxu1 %v2918_v6 }
 0x1cb   : > { %v2578_v34 = vpop.f32.mrf.mxu1 }
 0x1cd   : > { %v3253_v35 = vpop.f32.mrf.mxu1 }
 0x1ce   : > { %v1513_v18 = vpack.c.bf16 %v3253_v35, %v3253_v35 }
 0x1cf   : > { %v2593_v36 = vpop.f32.mrf.mxu1 }
 0x1d1   : > { %v1262_v37 = vpop.f32.mrf.mxu1 }
 0x1d3   : > { %v2594_v38 = vpop.f32.mrf.mxu1 }
 0x270   : > { %v1318_v40 = vpop.f32.mrf.mxu0 }
 0x271   : > { %v1319_v41 = vadd.f32 %v1318_v40, %v1273_v39  ;;  %v1657_v40 = vsel %vm1517_vm4, %v1513_v18, 0 }
 0x272   : > { %v2599_v42 = vpop.f32.mrf.mxu0 }
 0x273   : > { %v1462_v43 = vsel %vm1277_vm3, %v1319_v41, -inf }
 0x274   : > { %1463 = vmax.xlane.f32.xlu0 %v1462_v43  ;;  %v1321_v44 = vpop.f32.mrf.mxu0 }
 0x276   : > { %v2600_v45 = vpop.f32.mrf.mxu0 }
 0x277   : > { %v1703_v45 = vld [vmem:[%s3093_s30] sm:$0xf] }
 0x278   : > { %v1410_v46 = vpop.f32.mrf.mxu0 }
 0x279   : > { %v1411_v55 = vadd.f32 %v1410_v46, %v1275_v51  ;;  %v1711_v46 = vsel %vm1517_vm4, %v1703_v45, 0 }
 0x27a   : > { %v2611_v47 = vpop.f32.mrf.mxu0 }
 0x27b   : > { %v1468_v60 = vsel %vm1277_vm3, %v1411_v55, -inf  ;;  %v1704_v47 = vld [vmem:[%s3093_s30 + $0x4] sm:$0xf] }
 0x27c   : > { %v1413_v48 = vpop.f32.mrf.mxu0 }
 0x27d   : > { %v1757_v48 = vsel %vm1517_vm4, %v1704_v47, 0 }
 0x27e   : > { %v2612_v49 = vpop.f32.mrf.mxu0 }
 0x27f   : > { %v1705_v49 = vld [vmem:[%s3093_s30 + $0x8] sm:$0xf] }
 0x280   : > { %v1364_v52 = vpop.f32.mrf.mxu1 }
 0x281   : > { %v1365_v53 = vadd.f32 %v1364_v52, %v1274_v50  ;;  %v1803_v52 = vsel %vm1517_vm4, %v1705_v49, 0  ;;  %v2797_v49 = vld [vmem:[%s3108_s24 + $0x10] sm:$0xff]  }
 0x282   : > { %v2605_v54 = vpop.f32.mrf.mxu1 }
 0x283   : > { %v1465_v56 = vsel %vm1277_vm3, %v1365_v53, -inf }
 0x284   : > { %1466 = vmax.xlane.f32.xlu1 %v1465_v56  ;;  %v1367_v57 = vpop.f32.mrf.mxu1  ;;  %v1706_v56 = vld [vmem:[%s3093_s30 + $0xc] sm:$0xf] }
 0x286   : > { %v2606_v58 = vpop.f32.mrf.mxu1 }
 0x288   : > { %1469 = vmax.xlane.f32.xlu1 %v1468_v60  ;;  %v1456_v61 = vpop.f32.mrf.mxu1 }
 0x289   : > { %v1457_v62 = vadd.f32 %v1456_v61, %v1276_v59  ;;  %v1849_v59 = vsel %vm1517_vm4, %v1706_v56, 0 }
 0x28a   : > { %v2617_v63 = vpop.f32.mrf.mxu1 }
 0x28b   : > { %v1471_v0 = vsel %vm1277_vm3, %v1457_v62, -inf }
 0x28c   : > { %1472 = vmax.xlane.f32.xlu0 %v1471_v0  ;;  %v1459_v2 = vpop.f32.mrf.mxu1 }
 0x28e   : > { %v2618_v3 = vpop.f32.mrf.mxu1 }
 0x2fd   : > { %v1464_v4 = vpop.xlane.xlu0 %1463 }
 0x2fe   : > { %v1474_v5 = vsub.f32 %v1319_v41, %v1464_v4 }
 0x300   : > { %v1478_v7 = vmul.f32 1.442695, %v1474_v5 }
 0x302   : > { %2802 = vpow2.f32 %v1478_v7 }
 0x30d   : > { %v1467_v8 = vpop.xlane.xlu1 %1466 }
 0x30e   : > { %v1475_v9 = vsub.f32 %v1365_v53, %v1467_v8 }
 0x30f   : > { %v2803_v10 = vpop.eup %2802 }
 0x310   : > { %v1480_v11 = vmul.f32 1.442695, %v1475_v9  ;;  %v1486_v12 = vsel %vm1277_vm3, %v2803_v10, 0.0 }
 0x311   : > { %1487 = vadd.xlane.f32.xlu1 %v1486_v12  ;;  %v1470_v13 = vpop.xlane.xlu1 %1469 }
 0x312   : > { %2804 = vpow2.f32 %v1480_v11  ;;  %v1476_v14 = vsub.f32 %v1411_v55, %v1470_v13 }
 0x314   : > { %v1482_v15 = vmul.f32 1.442695, %v1476_v14 }
 0x315   : > { %v1473_v16 = vpop.xlane.xlu0 %1472 }
 0x316   : > { %2806 = vpow2.f32 %v1482_v15  ;;  %v1477_v17 = vsub.f32 %v1457_v62, %v1473_v16 }
 0x318   : > { %v1484_v19 = vmul.f32 1.442695, %v1477_v17 }
 0x31a   : > { %2808 = vpow2.f32 %v1484_v19 }
 0x31f   : > { %v2805_v20 = vpop.eup %2804 }
 0x320   : > { %v1489_v21 = vsel %vm1277_vm3, %v2805_v20, 0.0 }
 0x321   : > { %1490 = vadd.xlane.f32.xlu0 %v1489_v21 }
 0x323   : > { %v2807_v22 = vpop.eup %2806 }
 0x324   : > { %v1492_v23 = vsel %vm1277_vm3, %v2807_v22, 0.0 }
 0x325   : > { %1493 = vadd.xlane.f32.xlu1 %v1492_v23 }
 0x327   : > { %v2809_v24 = vpop.eup %2808 }
 0x328   : > { %v1495_v25 = vsel %vm1277_vm3, %v2809_v24, 0.0 }
 0x329   : > { %1496 = vadd.xlane.f32.xlu0 %v1495_v25 }
 0x39a   : > { %v1488_v26 = vpop.xlane.xlu1 %1487 }
 0x39b   : > { %2810 = vrcp.f32 %v1488_v26 }
 0x3a8   : > { %v2811_v27 = vpop.eup %2810 }
 0x3a9   : > { %v1502_v29 = vmul.f32 %v2811_v27, %v2803_v10 }
 0x3aa   : > { %v1491_v30 = vpop.xlane.xlu0 %1490 }
 0x3ab   : > { %2812 = vrcp.f32 %v1491_v30  ;;  %v1506_v31 = vpack.c.bf16 %v1502_v29, %v1502_v29 }
 0x3ad   : > { %2622 = vmatmul.mubr.msk.bf16.vlgmr.msra.gmra.mxu0 %vm1277_vm3, %v1506_v31 }
 0x3ae   : > { %2632 = vmatpush3.bf16.msra.mxu0 %v1611_v32  ;;  %v1494_v33 = vpop.xlane.xlu1 %1493  ;;  %2633 = vmatprep.mubr.msk.bf16.mxu0 %vm2919_vm2, %v2918_v6 }
 0x3af   : > { %2814 = vrcp.f32 %v1494_v33  ;;  %2643 = vmatprep.subr.bf16.mxu0 %v2918_v6 }
 0x3b2   : > { %v1497_v34 = vpop.xlane.xlu0 %1496 }
 0x3b3   : > { %2816 = vrcp.f32 %v1497_v34 }
 0x3b8   : > { %v2813_v36 = vpop.eup %2812 }
 0x3b9   : > { %v1503_v37 = vmul.f32 %v2813_v36, %v2805_v20 }
 0x3bb   : > { %v1507_v38 = vpack.c.bf16 %v1503_v37, %v1503_v37 }
 0x3bc   : > { %v2815_v39 = vpop.eup %2814 }
 0x3bd   : > { %2628 = vmatmul.mubr.msk.bf16.vlgmr.msra.gmra.mxu1 %vm1277_vm3, %v1507_v38  ;;  %v1504_v41 = vmul.f32 %v2815_v39, %v2807_v22  ;;  %v2792_v38 = vld [vmem:[%s3103_s25 + $0x8] sm:$0xff]   ;;  %v2793_v39 = vld [vmem:[%s3103_s25 + $0x18] sm:$0xff]  }
 0x3be   : > { %2638 = vmatpush3.bf16.msra.mxu1 %v1657_v40  ;;  %2639 = vmatprep.mubr.msk.bf16.mxu1 %vm2919_vm2, %v2918_v6  ;;  %v2794_v40 = vld [vmem:[%s3103_s25] sm:$0xff]  }
 0x3bf   : > { %v1508_v42 = vpack.c.bf16 %v1504_v41, %v1504_v41  ;;  %2649 = vmatprep.subr.bf16.mxu1 %v2918_v6  ;;  %v2795_v41 = vld [vmem:[%s3103_s25 + $0x10] sm:$0xff]  }
 0x3c0   : > { %v2817_v43 = vpop.eup %2816 }
 0x3c1   : > { %2634 = vmatmul.mubr.msk.bf16.vlgmr.msra.gmra.mxu0 %vm1277_vm3, %v1508_v42  ;;  %v1505_v35 = vmul.f32 %v2817_v43, %v2809_v24 }
 0x3c2   : > { %2645 = vmatprep.mubr.msk.bf16.mxu0 %vm2919_vm2, %v2918_v6  ;;  %2644 = vmatpush3.bf16.msra.mxu0 %v1711_v46 }
 0x3c3   : > { %v1509_v44 = vpack.c.bf16 %v1505_v35, %v1505_v35  ;;  %2655 = vmatprep.subr.bf16.mxu0 %v2918_v6 }
 0x3c5   : > { %2640 = vmatmul.mubr.msk.bf16.vlgmr.msra.gmra.mxu1 %vm1277_vm3, %v1509_v44  ;;  %v2399_v44 = vld [vmem:[%s551_s29] ss:$0 sm:$0xff] }
 0x3c6   : > { %2651 = vmatprep.mubr.msk.bf16.mxu1 %vm2919_vm2, %v2918_v6  ;;  %2650 = vmatpush3.bf16.msra.mxu1 %v1757_v48  ;;  %v2796_v48 = vld [vmem:[%s3108_s24 + $0x18] sm:$0xff]  }
 0x3c7   : > { %2661 = vmatprep.subr.bf16.mxu1 %v2918_v6 }
 0x46d   : > { %v1555_v50 = vpop.f32.mrf.mxu0 }
 0x46e   : > { %v1699_v51 = vpack.c.bf16 %v1555_v50, %v1555_v50  ;;  %v2798_v50 = vld [vmem:[%s3108_s24 + $0x8] sm:$0xff]  }
 0x46f   : > { %v2623_v53 = vpop.f32.mrf.mxu0 }
 0x470   : > { %2646 = vmatmul.mubr.msk.bf16.vlgmr.msra.gmra.mxu0 %vm1277_vm3, %v1699_v51  ;;  %v2799_v51 = vld [vmem:[%s3108_s24] sm:$0xff]  }
 0x471   : > { %v1558_v54 = vpop.f32.mrf.mxu0  ;;  %2656 = vmatpush3.bf16.msra.mxu0 %v1803_v52  ;;  %2657 = vmatprep.mubr.msk.bf16.mxu0 %vm2919_vm2, %v2918_v6 }
 0x472   : > { %2667 = vmatprep.subr.bf16.mxu0 %v2918_v6 }
 0x473   : > { %v2624_v55 = vpop.f32.mrf.mxu0 }
 0x47d   : > { %v1601_v57 = vpop.f32.mrf.mxu1 }
 0x47e   : > { %v1700_v58 = vpack.c.bf16 %v1601_v57, %v1601_v57 }
 0x47f   : > { %v2629_v60 = vpop.f32.mrf.mxu1 }
 0x480   : > { %2652 = vmatmul.mubr.msk.bf16.vlgmr.msra.gmra.mxu1 %vm1277_vm3, %v1700_v58 }
 0x481   : > { %v1604_v61 = vpop.f32.mrf.mxu1  ;;  %v1647_v62 = vpop.f32.mrf.mxu0  ;;  %2662 = vmatpush3.bf16.msra.mxu1 %v1849_v59  ;;  %2663 = vmatprep.mubr.msk.bf16.mxu1 %vm2919_vm2, %v2918_v6 }
 0x482   : > { %v1701_v63 = vpack.c.bf16 %v1647_v62, %v1647_v62  ;;  %2675 = vmatprep.subr.bf16.mxu1 %v2918_v6 }
 0x483   : > { %v2630_v0 = vpop.f32.mrf.mxu1  ;;  %v2635_v2 = vpop.f32.mrf.mxu0 }
 0x484   : > { %2658 = vmatmul.mubr.msk.bf16.vlgmr.msra.gmra.mxu0 %vm1277_vm3, %v1701_v63 }
 0x485   : > { %v1650_v3 = vpop.f32.mrf.mxu0  ;;  %v1693_v4 = vpop.f32.mrf.mxu1  ;;  %2671 = vmatprep.mubr.msk.bf16.mxu0 %vm2919_vm2, %v2918_v6  ;;  %2668 = vmatpush3.bf16.msra.mxu0 %v2792_v38 }
 0x486   : > { %v1702_v5 = vpack.c.bf16 %v1693_v4, %v1693_v4  ;;  %2669 = vmatprep.subr.bf16.mxu0 %v2918_v6 }
 0x487   : > { %v2636_v7 = vpop.f32.mrf.mxu0  ;;  %v2641_v8 = vpop.f32.mrf.mxu1 }
 0x488   : > { %2664 = vmatmul.mubr.msk.bf16.vlgmr.msra.gmra.mxu1 %vm1277_vm3, %v1702_v5 }
 0x489   : > { %v1696_v9 = vpop.f32.mrf.mxu1  ;;  %2679 = vmatprep.mubr.msk.bf16.mxu1 %vm2919_vm2, %v2918_v6  ;;  %2676 = vmatpush3.bf16.msra.mxu1 %v2793_v39 }
 0x48a   : > { %2677 = vmatprep.subr.bf16.mxu1 %v2918_v6  ;;  %2670 = vmatpush3.bf16.msra.mxu0 %v2794_v40 }
 0x48b   : > { %v2642_v10 = vpop.f32.mrf.mxu1  ;;  %2683 = vmatprep.subr.bf16.mxu0 %v2918_v6 }
 0x48d   : > { %2678 = vmatpush3.bf16.msra.mxu1 %v2795_v41 }
 0x530   : > { %v1747_v11 = vpop.f32.mrf.mxu0 }
 0x531   : > { %v1891_v21 = vsel %vm573_vm1, %v1747_v11, 0.0 }
 0x532   : > { %v2647_v12 = vpop.f32.mrf.mxu0 }
 0x534   : > { %v1750_v13 = vpop.f32.mrf.mxu0 }
 0x536   : > { %v2648_v14 = vpop.f32.mrf.mxu0 }
 0x540   : > { %v1793_v15 = vpop.f32.mrf.mxu1 }
 0x541   : > { %v1892_v17 = vsel %vm573_vm1, %v1793_v15, 0.0 }
 0x542   : > { %v2653_v16 = vpop.f32.mrf.mxu1  ;;  %v1893_v23 = vadd.f32 %v1892_v17, %v1891_v21 }
 0x544   : > { %v1796_v19 = vpop.f32.mrf.mxu1  ;;  %v1839_v20 = vpop.f32.mrf.mxu0 }
 0x545   : > { %v1894_v22 = vsel %vm573_vm1, %v1839_v20, 0.0 }
 0x546   : > { %v2654_v24 = vpop.f32.mrf.mxu1  ;;  %v2659_v25 = vpop.f32.mrf.mxu0  ;;  %v1895_v26 = vadd.f32 %v1894_v22, %v1893_v23 }
 0x548   : > { %v1842_v27 = vpop.f32.mrf.mxu0  ;;  %v1885_v28 = vpop.f32.mrf.mxu1 }
 0x549   : > { %v1896_v29 = vsel %vm573_vm1, %v1885_v28, 0.0 }
 0x54a   : > { %v1897_v30 = vadd.f32 %v1896_v29, %v1895_v26  ;;  %v2660_v31 = vpop.f32.mrf.mxu0  ;;  %v2665_v32 = vpop.f32.mrf.mxu1 }
 0x54c   : > { %v3316_v33 = vadd.f32 %v1897_v30, %v3112_v1  ;;  %v1888_v34 = vpop.f32.mrf.mxu1 }
 0x54e   : > { %v2666_v36 = vpop.f32.mrf.mxu1  ;;  %v1900_v18 = vmul.f32 %v3316_v33, %v3316_v33 }
 0x550   : > { %v1901_v37 = vsel %vm573_vm1, %v1900_v18, 0.0 }
 0x551   : > { %1902 = vadd.xlane.f32.xlu1 %v1901_v37 }
 0x5da   : > { %v1903_v1 = vpop.xlane.xlu1 %1902 }
 0x5db   : > { %v1904_v42 = vmul.f32 0.03125, %v1903_v1 }
 0x5dd   : > { %v1905_v43 = vadd.f32 1e-06, %v1904_v42 }
 0x5df   : > { %2818 = vrsqrt.f32 %v1905_v43 }
 0x5ec   : > { %v2819_v35 = vpop.eup %2818 }
 0x5ed   : > { %v1907_v45 = vmul.f32 %v2819_v35, %v3316_v33 }
 0x5ef   : > { %v1914_v46 = vmul.f32 %v2399_v44, %v1907_v45 }
 0x5f1   : > { %v1915_v47 = vpack.c.bf16 %v1914_v46, %v1914_v46 }
 0x5f3   : > { %2672 = vmatmul.mubr.msk.bf16.vlgmr.msra.gmra.mxu0 %vm573_vm1, %v1915_v47  ;;  %2680 = vmatmul.mubr.msk.bf16.vlgmr.msra.gmra.mxu1 %vm573_vm1, %v1915_v47 }
 0x5f4   : > { %2691 = vmatprep.mubr.msk.bf16.mxu0 %vm2919_vm2, %v2918_v6  ;;  %2684 = vmatpush3.bf16.msra.mxu0 %v2796_v48 }
 0x5f5   : > { %2685 = vmatprep.subr.bf16.mxu0 %v2918_v6 }
 0x5f8   : > { %2686 = vmatpush3.bf16.msra.mxu0 %v2797_v49 }
 0x5f9   : > { %2687 = vmatprep.subr.bf16.mxu0 %v2918_v6 }
 0x5fc   : > { %2688 = vmatpush3.bf16.msra.mxu0 %v2798_v50 }
 0x5fd   : > { %2689 = vmatprep.subr.bf16.mxu0 %v2918_v6 }
 0x600   : > { %2690 = vmatpush3.bf16.msra.mxu0 %v2799_v51 }
 0x6b3   : > { %v1969_v52 = vpop.f32.mrf.mxu0  ;;  %v2035_v53 = vpop.f32.mrf.mxu1 }
 0x6b4   : > { %v1975_v54 = vmul.f32 %v1969_v52, %v1969_v52 }
 0x6b5   : > { %v2673_v55 = vpop.f32.mrf.mxu0  ;;  %v2681_v56 = vpop.f32.mrf.mxu1 }
 0x6b6   : > { %v1976_v57 = vmul.f32 %v1975_v54, %v1969_v52 }
 0x6b7   : > { %v1972_v58 = vpop.f32.mrf.mxu0  ;;  %v2038_v59 = vpop.f32.mrf.mxu1 }
 0x6b8   : > { %v1977_v60 = vmul.f32 0.044715, %v1976_v57 }
 0x6b9   : > { %v2674_v61 = vpop.f32.mrf.mxu0  ;;  %v2682_v62 = vpop.f32.mrf.mxu1 }
 0x6ba   : > { %v1978_v63 = vadd.f32 %v1977_v60, %v1969_v52 }
 0x6bc   : > { %v1979_v0 = vmul.f32 0.7978846, %v1978_v63 }
 0x6be   : > { %2820 = vtanh.f32 %v1979_v0 }
 0x6cb   : > { %v2821_v2 = vpop.eup %2820 }
 0x6cc   : > { %v1981_v3 = vadd.f32 1.0, %v2821_v2 }
 0x6ce   : > { %v1982_v4 = vmul.f32 0.5, %v1981_v3 }
 0x6d0   : > { %v1983_v6 = vmul.f32 %v1982_v4, %v1969_v52 }
 0x6d2   : > { %v2041_v5 = vmul.f32 %v2035_v53, %v1983_v6 }
 0x6d4   : > { %v2042_v7 = vpack.c.bf16 %v2041_v5, %v2041_v5 }
 0x6d6   : > { %2692 = vmatmul.mubr.msk.bf16.vlgmr.msra.gmra.mxu0 %vm2075_vm5, %v2042_v7 }
 0x796   : > { %v2113_v8 = vpop.f32.mrf.mxu0 }
 0x797   : > { %v2119_v9 = vadd.f32 %v2113_v8, %v3316_v33 }
 0x798   : > { %v2693_v10 = vpop.f32.mrf.mxu0  ;;  %2124 = sbr.rel (%p2415_p1) target bundleno = 2113 (0x841), region = 72 }
 0x799   : > { %2120 = vst.msk [vmem:[#allocation2] sm:$0xff] %vm573_vm1, %v2119_v9 }
 0x79a   : > { %v2116_v11 = vpop.f32.mrf.mxu0 }
 0x79c   : > { %v2694_v12 = vpop.f32.mrf.mxu0 }
 0x79d   : > { %v2126_v13 = vmul.f32 %v2119_v9, %v2119_v9  ;;  %v2416_v20 = vld [vmem:[%s3413_s10] ss:$0 sm:$0xff] }
 0x79f   : > { %v2127_v14 = vsel %vm573_vm1, %v2126_v13, 0.0 }
 0x7a0   : > { %2128 = vadd.xlane.f32.xlu0 %v2127_v14 }
 0x829   : > { %v2129_v15 = vpop.xlane.xlu0 %2128 }
 0x82a   : > { %v2130_v16 = vmul.f32 0.03125, %v2129_v15 }
 0x82c   : > { %v2131_v17 = vadd.f32 1e-06, %v2130_v16 }
 0x82e   : > { %2822 = vrsqrt.f32 %v2131_v17 }
 0x83b   : > { %v2823_v19 = vpop.eup %2822 }
 0x83c   : > { %v2133_v21 = vmul.f32 %v2823_v19, %v2119_v9 }
 0x83e   : > { %v2140_v22 = vmul.f32 %v2416_v20, %v2133_v21 }
 0x840   : > { %2141 = vst.msk [vmem:[%s516_s12] sm:$0xff] %vm573_vm1, %v2140_v22 }
 0x841 PF: > { %s3451_s20 = sld [smem:[#allocation9_spill]]  ;;  %s2156_s29 = sshll.u32 %s516_s12, 4  ;;  %s2157_s29 = int_to_ptr.vmem [resolvable:$true] %s2156_s29 }
 0x842   : > { %s3452_s26 = sld [smem:[#allocation7_spill]]  ;;  %s2824_s28 = scalar_lea.vmem %s2157_s29, 128 }
 0x843   : > { %s3454_s19 = sld [smem:[#allocation21_spill]]  ;;  %p2825_p2 = scmp.ne.s32.totalorder %s2157_s29, %s2824_s28 }
 0x844   : > { %s2920_s24 = smov [#allocation3]  }
 0x845   : > { %p2826_p4 = pnand %p2825_p2, %p3030_p3  ;;  %s2828_s0 = sshll.u32 %s2920_s24, 4  ;;  %s2829_s0 = int_to_ptr.vmem [resolvable:$false] %s2828_s0 }
 0x846   : > { %s2830_s1 = scalar_lea.vmem %s2829_s0, 256  ;;  %p2831_p6 = scmp.lt.s32.totalorder %s2157_s29, %s2829_s0 }
 0x847   : > { %s2418_s22 = sshll.u32 %s3451_s20, 7  ;;  %p2827_p5 = pneg %p2826_p4 }
 0x848   : > { %s3456_s21 = sand.u32 1, %s3452_s26   ;;  %p2832_p7 = scmp.lt.s32.totalorder %s2830_s1, %s2824_s28 }
 0x849   : > { %s3455_s30 = smov %s3454_s19  ;;  %s2154_s11 = scalar_lea.hbm %s3454_s19, %s2418_s22 }
 0x84a   : > { %s2143_s25 = scalar_lea.sflag [#allocation4], %s3456_s21  ;;  %p2833_p8 = por %p2832_p7, %p2831_p6 }
 0x84c   : > { %p2834_p10 = pnand %p2833_p8, %p2827_p5 }
 0x84e   : > { %2837 = shalt.err (!%p2834_p10)
}
 0x84f   : > { %s2838_s3 = scalar_lea.hbm %s2154_s11, 128  ;;  %s2842_s17 = scalar_lea.hbm %s3455_s30, 256 }
 0x850   : > { %p2839_p11 = scmp.ne.s32.totalorder %s2154_s11, %s2838_s3  ;;  %p2843_p0 = scmp.lt.s32.totalorder %s2154_s11, %s3455_s30 }
 0x851   : > { %p2844_p1 = scmp.lt.s32.totalorder %s2842_s17, %s2838_s3 }
 0x852   : > { %p2840_p12 = pnand %p2839_p11, %p3030_p3 }
 0x853   : > { %p2845_p2 = por %p2844_p1, %p2843_p0 }
 0x854   : > { %p2841_p13 = pneg %p2840_p12 }
 0x856   : > { %p2846_p4 = pnand %p2845_p2, %p2841_p13 }
 0x858   : > { %2849 = shalt.err (!%p2846_p4)
}
 0x859   : > { %2695 = dma.vmem_to_hbm [thread:$0]  (%p3030_p3), %s2157_s29, 128, %s2154_s11, %s2143_s25  }
 0x85a PF: > { %s3457_s15 = sld [smem:[#allocation12_spill]] }
 0x85b   : > { %s3458_s20 = sld [smem:[#allocation6_spill]] }
 0x860   : > { %p2701_p5 = scmp.ge.s32.totalorder %s3457_s15, 2 }
 0x861   : > { %s2168_s22 = sand.u32 1, %s3458_s20  }
 0x862   : > { %p2698_p6 = pnand %p2701_p5, %p3040_p9  ;;  %s2169_s14 = scalar_lea.sflag [#allocation4], %s2168_s22 }
 0x864   : > { %p2699_p7 = pneg %p2698_p6 }
 0x866   : > { %2883 = dma.done.wait (%p2699_p7), %s2169_s14, 128  }
 0x867   : > { %2885 = vsyncadd (%p2699_p7), %s2169_s14, 4294967168  ;;  %s24_s24 = sadd.s32 1, %s3457_s15   ;;  %s3460_s17 = sld [smem:[#allocation7_spill]] }
 0x868   : > { %p21_p8 = scmp.ge.s32.totalorder %s24_s24, 6   ;;  %s3461_s18 = sld [smem:[#allocation8_spill]] }
 0x869   : > { %s3462_s19 = sld [smem:[#allocation17_spill]] }
 0x86a   : > { %s3463_s20 = sld [smem:[#allocation10_spill]]  ;;  %23 = sbr.rel (!%p21_p8) target bundleno = 10 (0xa), region = 135 }
 0x86b   : > { %s3464_s21 = sld [smem:[#allocation11_spill]] }
 0x86c   : > { %s3465_s22 = sld [smem:[#allocation13_spill]] }
 0x86d   : > { %s3466_s23 = sld [smem:[#allocation15_spill]] }
 0x86f   :  { %2174 = vsyncpa [#allocation4], 1 }
 0x870   :  { %2176 = vsyncpa [#allocation4 + $0x1], 1 }

</bundles_post_ra>
